<compile_context>
chip_gen: v5e
topology: v5e:2x2
jax: 0.10.0
libtpu: 0.0.40
codegen_flags: <defaults>
</compile_context>

<pallas_src>
import jax
import jax.numpy as jnp
from jax.experimental import pallas as pl
from jax.experimental.pallas import tpu as pltpu


def _interp_matrix(out_size: int, in_size: int):
    """Row-interpolation matrix matching PyTorch bilinear, align_corners=False (built in f32)."""
    i = jnp.arange(out_size, dtype=jnp.float32)
    scale = in_size / out_size
    src = jnp.maximum((i + 0.5) * scale - 0.5, 0.0)
    i0f = jnp.floor(src)
    frac = src - i0f
    i0 = i0f.astype(jnp.int32)
    i1 = jnp.minimum(i0 + 1, in_size - 1)
    rows = jnp.arange(out_size)
    w = jnp.zeros((out_size, in_size), jnp.float32)
    w = w.at[rows, i0].add(1.0 - frac)
    w = w.at[rows, i1].add(frac)
    return w


def _bilinear_tile(other_ref, at_ref, bt_ref):
    """Bilinear-resize a (tc, Hi, Wi) channel tile to (tc, H, W), f32 accumulation.

    Both passes are single folded 2-D matmuls (channels folded into M) so the small weight
    matrices stay MXU-stationary; the (0, 2, 1) transposes are XLU minor-dim transposes.
    # TODO(synk): the reshapes are free views only when Hi/H are multiples of 8; otherwise
    # Mosaic inserts a VMEM relayout copy (correct, just slower).
    """
    _, tc, Hi, Wi = other_ref.shape
    H = at_ref.shape[1]
    W = bt_ref.shape[1]
    # Row (H) pass: contract Hi.
    ot = jnp.transpose(other_ref[0], (0, 2, 1)).reshape(tc * Wi, Hi)
    s = jnp.dot(ot.astype(at_ref.dtype), at_ref[...],
                preferred_element_type=jnp.float32)            # (tc*Wi, H) f32
    # Column (W) pass: contract Wi.
    s = jnp.transpose(s.reshape(tc, Wi, H), (0, 2, 1)).reshape(tc * H, Wi)
    out = jnp.dot(s.astype(bt_ref.dtype), bt_ref[...],
                  preferred_element_type=jnp.float32)          # (tc*H, W) f32
    return out.reshape(tc, H, W)


def _combine_kernel(x_ref, other_ref, at_ref, bt_ref, out_ref):
    # x_ref: (1,tc,H,W); other_ref: (1,tc,Hi,Wi); at_ref: (Hi,H); bt_ref: (Wi,W);
    # out_ref: (1,2,tc,H,W)  -- [:,0]=x pass-through, [:,1]=interp.
    out_ref[0, 0] = x_ref[0]
    interp = _bilinear_tile(other_ref, at_ref, bt_ref)
    out_ref[0, 1] = interp.astype(out_ref.dtype)


def _combine_att_kernel(x_ref, other_ref, att_ref, at_ref, bt_ref, out_ref):
    # att_ref: (1, ca, Ha, Wa), broadcastable against (tc, H, W); broadcast happens in-register.
    out_ref[0, 0] = x_ref[0]
    interp = _bilinear_tile(other_ref, at_ref, bt_ref)
    interp = interp * att_ref[0].astype(jnp.float32)
    out_ref[0, 1] = interp.astype(out_ref.dtype)


def _vmem_budget():
    """(per-step working-set budget, vmem_limit_bytes), scaled to this TPU generation."""
    cap = 64 * 1024 * 1024                                  # conservative default (v7x physical)
    try:
        v = getattr(pltpu.get_tpu_info(), "vmem_capacity_bytes", None)
        if v:
            cap = int(v)
    except Exception:
        pass
    # v5e/v6e (128 MiB): 48 MiB budget / 96 MiB limit; v7x (64 MiB): 24 / 48 MiB.
    return (3 * cap) // 8, (3 * cap) // 4


def _pick_channel_tile(B, C, H, W, Hi, Wi, itemsize, att_per_c_elems, budget_bytes,
                       min_steps=8):
    """Largest divisor of C whose per-step VMEM footprint fits `budget_bytes`,
    then shrunk (if possible) so the grid keeps >= min_steps steps for pipelining / megacore."""
    # Double-buffered pipeline blocks: x + other + att (only if per-channel) + 2x-wide output.
    per_c = 2 * itemsize * (H * W + Hi * Wi + att_per_c_elems + 2 * H * W)
    # f32 in-kernel temps (transposed input, both matmul results, att broadcast).
    per_c += 4 * (Wi * Hi + 2 * H * Wi + 2 * H * W)
    tc = max(1, min(C, budget_bytes // max(per_c, 1)))
    while C % tc:
        tc -= 1
    # Keep enough grid steps for DMA/compute overlap and both v7x TensorCores.
    while tc > 1 and B * (C // tc) < min_steps:
        tc -= 1
        while C % tc:
            tc -= 1
    return tc


def combine_scales(x, other, att=None, disassembles=0, factor=2, mxu_bf16=True):
    """CombineScales.forward: concat((x, bilinear_resize(other) [* att]), axis=1)."""
    if disassembles != 0:
        # TODO(synk): Assemble/Disassemble/Reassemble spatial reshuffle (pure data movement via
        # unfold/permute/fold) not implemented; the module default disassembles=0 is identity.
        raise NotImplementedError("only disassembles=0 is implemented")

    B, C, H, W = x.shape
    Bo, Co, Hi, Wi = other.shape
    assert B == Bo and C == Co, "x and other must share batch/channel dims"

    dtype = x.dtype
    other = other.astype(dtype)
    # bf16 MXU passes with f32 accumulation for f32 inputs (~3-4x MXU throughput; the 2-tap
    # interpolation weights are exactly representable for integer factors, so error is ~1e-3).
    compute_dtype = jnp.bfloat16 if (dtype == jnp.float32 and mxu_bf16) else dtype

    at = _interp_matrix(H, Hi).T.astype(compute_dtype)      # (Hi, H)
    bt = _interp_matrix(W, Wi).T.astype(compute_dtype)      # (Wi, W)

    itemsize = jnp.dtype(dtype).itemsize
    budget, vmem_limit = _vmem_budget()

    att_per_c = 0
    if att is not None:
        att = att.astype(dtype)
        assert att.ndim == 4, "att must be rank-4 (broadcastable against x)"
        Ba, Ca, Ha, Wa = att.shape
        assert Ba in (1, B) and Ca in (1, C) and Ha in (1, H) and Wa in (1, W), (
            f"att shape {att.shape} not broadcastable against {(B, C, H, W)}")
        if Ca == C:                       # only charge att to the budget when it's per-channel
            att_per_c = Ha * Wa

    # TODO(synk): tc must divide C; prime/awkward C degrades to tc=1 (correct, just slower).
    tc = _pick_channel_tile(B, C, H, W, Hi, Wi, itemsize, att_per_c, budget)
    grid = (B, C // tc)

    x_spec = pl.BlockSpec((1, tc, H, W), lambda b, c: (b, c, 0, 0))
    other_spec = pl.BlockSpec((1, tc, Hi, Wi), lambda b, c: (b, c, 0, 0))
    at_spec = pl.BlockSpec((Hi, H), lambda b, c: (0, 0))    # constant block -> stays resident
    bt_spec = pl.BlockSpec((Wi, W), lambda b, c: (0, 0))    # constant block -> stays resident
    out_spec = pl.BlockSpec((1, 2, tc, H, W), lambda b, c: (b, 0, c, 0, 0))

    compiler_params = pltpu.CompilerParams(
        dimension_semantics=("parallel", "parallel"),
        vmem_limit_bytes=vmem_limit,
    )
    out_shape = jax.ShapeDtypeStruct((B, 2, C, H, W), dtype)

    if att is None:
        out = pl.pallas_call(
            _combine_kernel,
            out_shape=out_shape,
            grid_spec=pltpu.PrefetchScalarGridSpec(
                num_scalar_prefetch=0,
                grid=grid,
                in_specs=[x_spec, other_spec, at_spec, bt_spec],
                out_specs=out_spec,
            ),
            compiler_params=compiler_params,
        )(x, other, at, bt)
    else:
        Ba, Ca, Ha, Wa = att.shape
        ca = tc if Ca == C else 1

        def att_index(b, c, _Ba=Ba, _Ca=Ca, _B=B, _C=C):
            return (b if _Ba == _B else 0, c if _Ca == _C else 0, 0, 0)

        att_spec = pl.BlockSpec((1, ca, Ha, Wa), att_index)
        out = pl.pallas_call(
            _combine_att_kernel,
            out_shape=out_shape,
            grid_spec=pltpu.PrefetchScalarGridSpec(
                num_scalar_prefetch=0,
                grid=grid,
                in_specs=[x_spec, other_spec, att_spec, at_spec, bt_spec],
                out_specs=out_spec,
            ),
            compiler_params=compiler_params,
        )(x, other, att, at, bt)

    # (B, 2, C, H, W) -> (B, 2C, H, W): contiguous adjacent-dim merge, free (no HBM traffic).
    return out.reshape(B, 2 * C, H, W)


def _reference(x, other, att):
    """Pure-JAX f32 reference of the same math (for a sanity check)."""
    B, C, H, W = x.shape
    _, _, Hi, Wi = other.shape
    a = _interp_matrix(H, Hi)
    b = _interp_matrix(W, Wi)
    interp = jnp.einsum('ih,bchw,jw->bcij', a, other.astype(jnp.float32), b)
    interp = interp.astype(x.dtype)
    if att is not None:
        interp = interp * att.astype(x.dtype)
    return jnp.concatenate([x, interp], axis=1)


if __name__ == "__main__":
    key = jax.random.PRNGKey(0)
    k1, k2, k3 = jax.random.split(key, 3)
    # small shapes: batch=2, channels=4, x spatial 16x16, other spatial 8x8 (2x upsample)
    x = jax.random.normal(k1, (2, 4, 16, 16), jnp.float32)
    other = jax.random.normal(k2, (2, 4, 8, 8), jnp.float32)
    att = jax.random.uniform(k3, (2, 4, 16, 16), jnp.float32)

    ref = _reference(x, other, att)

    # default path: bf16 MXU passes with f32 accumulation
    out = jax.block_until_ready(combine_scales(x, other, att=att))
    assert out.shape == (2, 8, 16, 16), out.shape
    assert jnp.allclose(out, ref, atol=5e-2, rtol=5e-2)

    # exact f32 MXU path
    out_f32 = jax.block_until_ready(combine_scales(x, other, att=att, mxu_bf16=False))
    assert jnp.allclose(out_f32, ref, atol=1e-5, rtol=1e-5)

    # att=None path (dedicated kernel variant, no ones tensor materialized), exact f32
    out_na = jax.block_until_ready(combine_scales(x, other, att=None, mxu_bf16=False))
    assert jnp.allclose(out_na, _reference(x, other, None), atol=1e-5, rtol=1e-5)

    # channel-broadcast attention consumed at its native shape (no HBM-side broadcast)
    att_b = att[:, :1]                       # (2, 1, 16, 16)
    out_b = jax.block_until_ready(combine_scales(x, other, att=att_b))
    assert jnp.allclose(out_b, _reference(x, other, att_b), atol=5e-2, rtol=5e-2)

    print("KERNEL_OK")
</pallas_src>

<mosaic_0001>
module attributes {stable_mosaic.version = 11 : i64} {
  func.func @_combine_att_kernel(%arg0: i32, %arg1: i32, %arg2: memref<1x1x16x16xf32, #tpu.memory_space<vmem>>, %arg3: memref<1x1x8x8xf32, #tpu.memory_space<vmem>>, %arg4: memref<1x1x16x16xf32, #tpu.memory_space<vmem>>, %arg5: memref<8x16xbf16, #tpu.memory_space<vmem>>, %arg6: memref<8x16xbf16, #tpu.memory_space<vmem>>, %arg7: memref<1x2x1x16x16xf32, #tpu.memory_space<vmem>>) attributes {dimension_semantics = [#tpu.dimension_semantics<parallel>, #tpu.dimension_semantics<parallel>], iteration_bounds = array<i64: 2, 4>, scalar_prefetch = 0 : i64, scratch_operands = 0 : i64, tpu.core_type = #tpu.core_type<tc>, window_params = [{transform_indices = @transform_0, window_bounds = array<i64: 1, 1, 16, 16>}, {transform_indices = @transform_1, window_bounds = array<i64: 1, 1, 8, 8>}, {transform_indices = @transform_2, window_bounds = array<i64: 1, 1, 16, 16>}, {pipeline_mode = #tpu.pipeline_mode<synchronous>, transform_indices = @transform_3, window_bounds = array<i64: 8, 16>}, {pipeline_mode = #tpu.pipeline_mode<synchronous>, transform_indices = @transform_4, window_bounds = array<i64: 8, 16>}, {transform_indices = @transform_5, window_bounds = array<i64: 1, 2, 1, 16, 16>}]} {
    %c0 = arith.constant 0 : index
    %c0_0 = arith.constant 0 : index
    %c0_1 = arith.constant 0 : index
    %c0_2 = arith.constant 0 : index
    %0 = vector.load %arg2[%c0, %c0_0, %c0_1, %c0_2] : memref<1x1x16x16xf32, #tpu.memory_space<vmem>>, vector<1x1x16x16xf32>
    %1 = vector.shape_cast %0 : vector<1x1x16x16xf32> to vector<1x16x16xf32>
    %c0_3 = arith.constant 0 : index
    %c0_4 = arith.constant 0 : index
    %c0_5 = arith.constant 0 : index
    %c0_6 = arith.constant 0 : index
    %c0_7 = arith.constant 0 : index
    %2 = vector.load %arg7[%c0_3, %c0_4, %c0_5, %c0_6, %c0_7] : memref<1x2x1x16x16xf32, #tpu.memory_space<vmem>>, vector<1x1x1x16x16xf32>
    %3 = vector.shape_cast %2 : vector<1x1x1x16x16xf32> to vector<1x16x16xf32>
    %4 = vector.shape_cast %1 : vector<1x16x16xf32> to vector<1x1x1x16x16xf32>
    tpu.vector_store %arg7[%c0_3, %c0_4, %c0_5, %c0_6, %c0_7], %4 {strides = array<i32>} : memref<1x2x1x16x16xf32, #tpu.memory_space<vmem>>, vector<1x1x1x16x16xf32>,
    %c0_8 = arith.constant 0 : index
    %c0_9 = arith.constant 0 : index
    %c0_10 = arith.constant 0 : index
    %c0_11 = arith.constant 0 : index
    %5 = vector.load %arg3[%c0_8, %c0_9, %c0_10, %c0_11] : memref<1x1x8x8xf32, #tpu.memory_space<vmem>>, vector<1x1x8x8xf32>
    %6 = vector.shape_cast %5 : vector<1x1x8x8xf32> to vector<1x8x8xf32>
    %7 = tpu.transpose %6, [0, 2, 1] : vector<1x8x8xf32> -> vector<1x8x8xf32>
    %8 = vector.shape_cast %7 : vector<1x8x8xf32> to vector<8x8xf32>
    %9 = arith.truncf %8 : vector<8x8xf32> to vector<8x8xbf16>
    %c0_12 = arith.constant 0 : index
    %c0_13 = arith.constant 0 : index
    %10 = vector.load %arg5[%c0_12, %c0_13] : memref<8x16xbf16, #tpu.memory_space<vmem>>, vector<8x16xbf16>
    %cst = arith.constant dense<0.000000e+00> : vector<8x16xf32>
    %11 = tpu.matmul %9, %10, %cst {dimension_numbers = #tpu.dot_dimension_numbers<[1], [0], [0], [1], [0, 0, 1, 1], [], []>} : vector<8x8xbf16>, vector<8x16xbf16>, vector<8x16xf32> -> vector<8x16xf32>
    %12 = vector.shape_cast %11 : vector<8x16xf32> to vector<1x8x16xf32>
    %13 = tpu.transpose %12, [0, 2, 1] : vector<1x8x16xf32> -> vector<1x16x8xf32>
    %14 = vector.shape_cast %13 : vector<1x16x8xf32> to vector<16x8xf32>
    %15 = arith.truncf %14 : vector<16x8xf32> to vector<16x8xbf16>
    %c0_14 = arith.constant 0 : index
    %c0_15 = arith.constant 0 : index
    %16 = vector.load %arg6[%c0_14, %c0_15] : memref<8x16xbf16, #tpu.memory_space<vmem>>, vector<8x16xbf16>
    %cst_16 = arith.constant dense<0.000000e+00> : vector<16x16xf32>
    %17 = tpu.matmul %15, %16, %cst_16 {dimension_numbers = #tpu.dot_dimension_numbers<[1], [0], [0], [1], [0, 0, 1, 1], [], []>} : vector<16x8xbf16>, vector<8x16xbf16>, vector<16x16xf32> -> vector<16x16xf32>
    %18 = vector.shape_cast %17 : vector<16x16xf32> to vector<1x16x16xf32>
    %c0_17 = arith.constant 0 : index
    %c0_18 = arith.constant 0 : index
    %c0_19 = arith.constant 0 : index
    %c0_20 = arith.constant 0 : index
    %19 = vector.load %arg4[%c0_17, %c0_18, %c0_19, %c0_20] : memref<1x1x16x16xf32, #tpu.memory_space<vmem>>, vector<1x1x16x16xf32>
    %20 = vector.shape_cast %19 : vector<1x1x16x16xf32> to vector<1x16x16xf32>
    %21 = arith.mulf %18, %20 : vector<1x16x16xf32>
    %c0_21 = arith.constant 0 : index
    %c1 = arith.constant 1 : index
    %c0_22 = arith.constant 0 : index
    %c0_23 = arith.constant 0 : index
    %c0_24 = arith.constant 0 : index
    %22 = vector.load %arg7[%c0_21, %c1, %c0_22, %c0_23, %c0_24] : memref<1x2x1x16x16xf32, #tpu.memory_space<vmem>>, vector<1x1x1x16x16xf32>
    %23 = vector.shape_cast %22 : vector<1x1x1x16x16xf32> to vector<1x16x16xf32>
    %24 = vector.shape_cast %21 : vector<1x16x16xf32> to vector<1x1x1x16x16xf32>
    tpu.vector_store %arg7[%c0_21, %c1, %c0_22, %c0_23, %c0_24], %24 {strides = array<i32>} : memref<1x2x1x16x16xf32, #tpu.memory_space<vmem>>, vector<1x1x1x16x16xf32>,
    return
  }
  func.func @transform_0(%arg0: i32, %arg1: i32) -> (i32, i32, i32, i32) {
    %c0_i32 = arith.constant 0 : i32
    %c0_i32_0 = arith.constant 0 : i32
    %c0_i32_1 = arith.constant 0 : i32
    return %arg0, %arg1, %c0_i32, %c0_i32_0 : i32, i32, i32, i32
  }
  func.func @transform_1(%arg0: i32, %arg1: i32) -> (i32, i32, i32, i32) {
    %c0_i32 = arith.constant 0 : i32
    %c0_i32_0 = arith.constant 0 : i32
    %c0_i32_1 = arith.constant 0 : i32
    return %arg0, %arg1, %c0_i32, %c0_i32_0 : i32, i32, i32, i32
  }
  func.func @transform_2(%arg0: i32, %arg1: i32) -> (i32, i32, i32, i32) {
    %c0_i32 = arith.constant 0 : i32
    %c0_i32_0 = arith.constant 0 : i32
    %c0_i32_1 = arith.constant 0 : i32
    return %arg0, %arg1, %c0_i32, %c0_i32_0 : i32, i32, i32, i32
  }
  func.func @transform_3(%arg0: i32, %arg1: i32) -> (i32, i32) {
    %c0_i32 = arith.constant 0 : i32
    %c0_i32_0 = arith.constant 0 : i32
    %c0_i32_1 = arith.constant 0 : i32
    return %c0_i32, %c0_i32_0 : i32, i32
  }
  func.func @transform_4(%arg0: i32, %arg1: i32) -> (i32, i32) {
    %c0_i32 = arith.constant 0 : i32
    %c0_i32_0 = arith.constant 0 : i32
    %c0_i32_1 = arith.constant 0 : i32
    return %c0_i32, %c0_i32_0 : i32, i32
  }
  func.func @transform_5(%arg0: i32, %arg1: i32) -> (i32, i32, i32, i32, i32) {
    %c0_i32 = arith.constant 0 : i32
    %c0_i32_0 = arith.constant 0 : i32
    %c0_i32_1 = arith.constant 0 : i32
    %c0_i32_2 = arith.constant 0 : i32
    return %arg0, %c0_i32, %arg1, %c0_i32_0, %c0_i32_1 : i32, i32, i32, i32, i32
  }
}

</mosaic_0001>

<bundles_post_ra>
// kernel: tpu_custom_call.1
= control target key start
LH: loop header
LB: loop body
LE: loop exit
PB: predicated region body
PF: predicated region fallthrough
CT: control target
= control target key end

     0   :  { %s1349_s0 = inlined_call_operand.hbm [shape: f32[2,4,16,16], index: 0, kind: input, shape index: {}]   ;;  %s1350_s1 = inlined_call_operand.hbm [shape: f32[2,4,8,8], index: 1, kind: input, shape index: {}]   ;;  %s1351_s2 = inlined_call_operand.hbm [shape: f32[2,4,16,16], index: 2, kind: input, shape index: {}]   ;;  %s1352_s3 = inlined_call_operand.hbm [shape: bf16[8,16], index: 3, kind: input, shape index: {}]   ;;  %s1353_s4 = inlined_call_operand.hbm [shape: bf16[8,16], index: 4, kind: input, shape index: {}]   ;;  %s1354_s5 = inlined_call_operand.hbm [shape: f32[2,2,4,16,16], index: 5, kind: output, shape index: {}]  }
   0x1   :  { %1363 = sst [smem:[#allocation27_spill]] %s1350_s1 }
   0x2   :  { %1364 = sst [smem:[#allocation28_spill]] %s1352_s3 }
   0x3   :  { %1365 = sst [smem:[#allocation29_spill]] %s1353_s4 }
   0x4   :  { %1366 = sst [smem:[#allocation30_spill]] %s1354_s5 }
   0x5   :  { %10 = vsyncpa [#allocation3], 0 }
   0x6   :  { %12 = vsyncpa [#allocation3 + $0x1], 0 }
   0x7   :  { %13 = vsyncpa [#allocation6], 0 }
   0x8   :  { %15 = vsyncpa [#allocation6 + $0x1], 0 }
   0x9   :  { %16 = vsyncpa [#allocation9], 0 }
   0xa   :  { %17 = vsyncpa [#allocation4], 0 }
   0xb   :  { %19 = vsyncpa [#allocation4 + $0x1], 0  ;;  %s1129_s18 = smov 0   ;;  %s1131_s19 = smov 0  }
   0xc   :  { %s1133_s20 = smov 0   ;;  %s1135_s21 = smov 0  }
   0xd   :  { %s1137_s22 = smov 0   ;;  %s1139_s23 = smov 0  }
   0xe   :  { %s1141_s24 = smov 0   ;;  %s1143_s25 = smov 0  }
   0xf LB: > { %1367 = sst [smem:[#allocation18_spill]] %s1058_s18  ;;  %s1170_s26 = sadd.s32 4294967295, %s1086_s25   ;;  %s1086_s25 = sphi %s1143_s25, %s25_s25   ;;  %s1082_s24 = sphi %s1141_s24, %s1394_s24   ;;  %s1078_s23 = sphi %s1139_s23, %s1393_s23   ;;  %s1074_s22 = sphi %s1137_s22, %s1392_s22   ;;  %s1070_s21 = sphi %s1135_s21, %s1391_s21   ;;  %s1066_s20 = sphi %s1133_s20, %s1397_s20   ;;  %s1062_s19 = sphi %s1131_s19, %s1396_s19   ;;  %s1058_s18 = sphi %s1129_s18, %s1395_s18  }
  0x10   : > { %1368 = sst [smem:[#allocation19_spill]] %s1070_s21  ;;  %s700_s27 = sadd.s32 4294967294, %s1086_s25  }
  0x11   : > { %1369 = sst [smem:[#allocation20_spill]] %s1074_s22  ;;  %p59_p0 = scmp.ne.s32.totalorder %s1062_s19, %s1058_s18 }
  0x12   : > { %1370 = sst [smem:[#allocation21_spill]] %s1078_s23  ;;  %p60_p1 = scmp.eq.s32.totalorder %s1170_s26, 0 }
  0x13   : > { %1371 = sst [smem:[#allocation22_spill]] %s1082_s24  ;;  %p183_p2 = scmp.eq.s32.totalorder %s1170_s26, 7 }
  0x14   : > { %p189_p3 = scmp.eq.s32.totalorder %s700_s27, 7  ;;  %p1179_p4 = por %p60_p1, %p59_p0 }
  0x15   : > { %p701_p5 = scmp.ge.s32.totalorder %s1086_s25, 1  ;;  %p196_p7 = scmp.lt.s32.totalorder %s1086_s25, 9 }
  0x16   : > { %p1184_p6 = por %p189_p3, %p59_p0  ;;  %s1375_s3 = sld [smem:[#allocation28_spill]] }
  0x17   : > { %p1192_p8 = pnand %p701_p5, %p196_p7  ;;  %s1088_s9 = smov [#allocation8]  }
  0x18   : > { %s1373_s29 = scalar_select %p1184_p6, 1, 0 }
  0x19   : > { %p755_p9 = pneg %p1192_p8  ;;  %s210_s10 = sshll.u32 %s1088_s9, 4  ;;  %s211_s10 = int_to_ptr.vmem [resolvable:$true] %s210_s10 }
  0x1a   : > { %1374 = sst [smem:[#allocation23_spill]] %s1373_s29  ;;  %s34_s12 = sadd.s32 1, %s1078_s23 }
  0x1b   : > { %p1200_p10 = pnand %p755_p9, %p60_p1  ;;  %p35_p11 = scmp.ge.s32.totalorder %s34_s12, 4 }
  0x1c   : > { %s208_s7 = sshll.u32 %s1375_s3, 4  ;;  %s37_s13 = sadd.s32 1, %s1082_s24  ;;  %s209_s7 = int_to_ptr.hbm [resolvable:$true] %s208_s7 }
  0x1d   : > { %758 = dma.hbm_to_vmem [thread:$0]  (!%p1200_p10), %s209_s7, 64, %s211_s10, [#allocation9]  }
  0x1e   : > { %s46_s14 = sadd.s32 1, %s1066_s20  ;;  %p53_p12 = scmp.ne.s32.totalorder %s1066_s20, %s1062_s19 }
  0x1f   : > { %s1399_s12 = smov (%p35_p11, %s34_s12), 0  ;;  %s1401_s13 = smov (!%p35_p11, %s37_s13), %s1082_s24 }
  0x20   : > { %1378 = sst [smem:[#allocation24_spill]] %s1399_s12  ;;  %s42_s15 = ssub.s32 %s1078_s23, %s1399_s12 }
  0x21   : > { %p54_p13 = scmp.eq.s32.totalorder %s1086_s25, 0  ;;  %p39_p0 = scmp.ge.s32.totalorder %s1401_s13, 2 }
  0x22   : > { %p1219_p3 = por %p183_p2, %p53_p12  ;;  %p778_p7 = scmp.lt.s32.totalorder %s1086_s25, 8 }
  0x23   : > { %p55_p5 = por %p54_p13, %p53_p12  ;;  %s1403_s13 = smov (%p39_p0, %s1401_s13), 0 }
  0x24   : > { %s1379_s16 = scalar_select %p1219_p3, 1, 0 }
  0x25   : > { %1381 = sst [smem:[#allocation26_spill]] %s1403_s13  ;;  %s1227_s17 = sand.u32 1, %s1066_s20  }
  0x26   : > { %1380 = sst [smem:[#allocation25_spill]] %s1379_s16  ;;  %p1229_p9 = pnand %p778_p7, %p55_p5 }
  0x27   : > { %s41_s30 = ssub.s32 %s1082_s24, %s1403_s13  ;;  %s705_s6 = sshll.u32 %s1227_s17, 4 }
  0x28   : > { %s43_s7 = sor.u32 %s42_s15, %s41_s30  ;;  %s257_s9 = sand.u32 1, %s1086_s25  }
  0x29   : > { %p44_p2 = scmp.eq.s32.totalorder %s43_s7, 0  ;;  %s709_s10 = sshll.u32 %s1227_s17, 3 }
  0x2a   : > { %s710_s12 = sshll.u32 %s1082_s24, 2  ;;  %s261_s18 = scalar_lea.vmem [#allocation5], %s709_s10 }
  0x2b   : > { %s1239_s3 = scalar_select %p44_p2, %s1066_s20, %s46_s14  }
  0x2c   : > { %s265_s29 = sadd.s32 %s1078_s23, %s710_s12  ;;  %s271_s5 = sshll.u32 %s261_s18, 4  ;;  %s272_s5 = int_to_ptr.vmem [resolvable:$true] %s271_s5 }
  0x2d   : > { %s711_s16 = sshll.u32 %s265_s29, 3  ;;  %s1383_s1 = sld [smem:[#allocation27_spill]] }
  0x2e   : > { %s282_s30 = scalar_lea.vmem [#allocation7], %s705_s6  ;;  %s1248_s14 = scalar_lea.sflag [#allocation6], %s257_s9 }
  0x2f   : > { %s292_s7 = sshll.u32 %s282_s30, 4  ;;  %s1384_s4 = sld [smem:[#allocation29_spill]]  ;;  %s1246_s7 = int_to_ptr.vmem [resolvable:$true] %s292_s7 }
  0x30   : > { %s1089_s10 = smov [#allocation10]   ;;  %s706_s22 = sshll.u32 %s1078_s23, 1 }
  0x31   : > { %s222_s21 = sshll.u32 %s1089_s10, 4  ;;  %s1091_s23 = smov 8   ;;  %s223_s21 = int_to_ptr.vmem [resolvable:$true] %s222_s21 }
  0x33   : > { %s267_s13 = scalar_lea.hbm %s1383_s1, %s711_s16  ;;  %s237_s16 = scalar_lea.vmem [#allocation2], %s705_s6 }
  0x34   : > { %s269_s15 = sshll.u32 %s267_s13, 4  ;;  %s707_s13 = sshll.u32 %s1082_s24, 3  ;;  %s270_s15 = int_to_ptr.hbm [resolvable:$true] %s269_s15 }
  0x35   : > { %768 = dma.hbm_to_vmem [thread:$0]  (!%p1229_p9), %s270_s15, 128, %s272_s5, %s1248_s14  }
  0x36   : > { %s220_s12 = sshll.u32 %s1384_s4, 4  ;;  %s247_s9 = sshll.u32 %s237_s16, 4  ;;  %s221_s12 = int_to_ptr.hbm [resolvable:$true] %s220_s12  ;;  %s248_s9 = int_to_ptr.vmem [resolvable:$true] %s247_s9 }
  0x37   : > { %761 = dma.hbm_to_vmem [thread:$0]  (!%p1200_p10), %s221_s12, 64, %s223_s21, [#allocation9]  }
  0x38   : > { %s242_s5 = sadd.s32 %s707_s13, %s706_s22  ;;  %s234_s21 = scalar_lea.sflag [#allocation3], %s1227_s17 }
  0x39   : > { %s708_s15 = sshll.u32 %s242_s5, 3  ;;  %s1090_s24 = smov 128  }
  0x3a   : > { %s244_s29 = scalar_lea.hbm %s1349_s0, %s708_s15  ;;  %s289_s11 = scalar_lea.hbm %s1351_s2, %s708_s15 }
  0x3b   : > { %s245_s1 = sshll.u32 %s244_s29, 4  ;;  %s290_s12 = sshll.u32 %s289_s11, 4  ;;  %s246_s1 = int_to_ptr.hbm [resolvable:$true] %s245_s1  ;;  %s291_s12 = int_to_ptr.hbm [resolvable:$true] %s290_s12 }
  0x3c   : > { %765 = dma.hbm_to_vmem [thread:$0]  (!%p1229_p9), %s246_s1, 256, %s248_s9, %s234_s21, %s1090_s24, %s1090_s24, %s1091_s23  }
  0x3d   : > { %771 = dma.hbm_to_vmem [thread:$0]  (!%p1229_p9), %s291_s12, 256, %s1246_s7, %s1248_s14, %s1090_s24, %s1090_s24, %s1091_s23  }
  0x3e   : > { %304 = sbr.rel (%p1192_p8) target bundleno = 692 (0x2b4), region = 40  ;;  %s1276_s6 = sand.u32 (!%p1192_p8), 1, %s1062_s19  }
  0x3f   : > { %s717_s4 = sshll.u32 (!%p1192_p8), %s1276_s6, 4  ;;  %s307_s22 = scalar_lea.sflag (!%p1192_p8), [#allocation3], %s1276_s6 }
  0x40   : > { %s310_s13 = scalar_lea.vmem (!%p1192_p8), [#allocation2], %s717_s4 }
  0x43   : > { %1041 = dma.done.wait (%p1179_p4), %s307_s22, 256  }
  0x44   : > { %1043 = vsyncadd (%p1179_p4), %s307_s22, 4294967040  ;;  %s316_s1 = sand.u32 1, %s1170_s26   ;;  %s718_s23 = sshll.u32 %s1276_s6, 3 }
  0x45   : > { %s317_s24 = scalar_lea.sflag [#allocation6], %s316_s1  ;;  %s320_s8 = scalar_lea.vmem [#allocation5], %s718_s23 }
  0x46   : > { %1045 = dma.done.wait (%p1179_p4), %s317_s24, 384  }
  0x47   : > { %1047 = vsyncadd (%p1179_p4), %s317_s24, 4294966912  ;;  %s1290_s17 = scalar_lea.vmem [#allocation7], %s717_s4 }
  0x48   : > { %1049 = dma.done.wait (%p60_p1), [#allocation9], 128  }
  0x49   : > { %1051 = vsyncadd (%p60_p1), [#allocation9], 4294967168  ;;  %vm423_vm0 = vcmask 1043456   ;;  %v384_v0 = vld [vmem:[%s320_s8] sm:$0xff]  ;;  %v418_v1 = vld [vmem:[#allocation8] sm:$0xf] }
  0x4a   : > { %385 = vxpose.xlu0.b32.start.end [1/1] (short) (narrow) %v384_v0, 8  ;;  %v425_v2 = vsel %vm423_vm0, %v418_v1, 0  ;;  %vm419_vm1 = vcmask 64512   ;;  %v473_v7 = vld [vmem:[#allocation10] sm:$0xf]  ;;  %s722_s26 = sshll.u32 %s1276_s6, 5 }
  0x4b   : > { %434 = vmatpush.bf16.msra.mxu0 %v425_v2  ;;  %v478_v8 = vsel %vm423_vm0, %v473_v7, 0  ;;  %v379_v9 = vld [vmem:[%s310_s13] sm:$0xff]  ;;  %v380_v10 = vld [vmem:[%s310_s13 + $0x8] sm:$0xff]  ;;  %vm381_vm2 = vcmask 130048   ;;  %s377_s28 = scalar_lea.vmem [#allocation11], %s722_s26  ;;  %v494_v14 = vld [vmem:[%s1290_s17] sm:$0xff] }
  0x4c   : > { %487 = vmatpush.bf16.msra.mxu1 %v478_v8  ;;  %382 = vst.msk [vmem:[%s377_s28] sm:$0xff] %vm381_vm2, %v379_v9  ;;  %v495_v17 = vld [vmem:[%s1290_s17 + $0x8] sm:$0xff]  ;;  %s502_s27 = scalar_lea.sflag [#allocation4], %s1276_s6 }
  0x4d   : > { %383 = vst.msk [vmem:[%s377_s28 + $0x8] sm:$0xff] %vm381_vm2, %v380_v10 }
  0xee   : > { %v401_v3 = vpop.trf.xlu0 }
  0xef   : > { %v417_v4 = vpack.c.bf16 %v401_v3, %v401_v3 }
  0xf1   : > { %723 = vmatmul.msk.bf16.vlgmr.msra.gmra.mxu0 %vm419_vm1, %v417_v4 }
 0x16e   : > { %v436_v5 = vpop.f32.mrf.mxu0 }
 0x16f   : > { %440 = vxpose.xlu0.b32.start.end [1/1] (short) (narrow) %v436_v5, 16 }
 0x176   : > { %v438_v6 = vpop.f32.mrf.mxu0 }
 0x213   : > { %v456_v11 = vpop.trf.xlu0 }
 0x21b   : > { %v457_v12 = vpop.trf.xlu0 }
 0x21c   : > { %v472_v13 = vpack.c.bf16 %v457_v12, %v456_v11 }
 0x21e   : > { %724 = vmatmul.msk.bf16.vlgmr.msra.gmra.mxu1 %vm419_vm1, %v472_v13 }
 0x29b   : > { %v489_v15 = vpop.f32.mrf.mxu1 }
 0x29c   : > { %v496_v16 = vmul.f32 %v494_v14, %v489_v15 }
 0x29e   : > { %725 = vst.msk [vmem:[%s377_s28 + $0x10] sm:$0xff] %vm381_vm2, %v496_v16 }
 0x2a3   : > { %v491_v18 = vpop.f32.mrf.mxu1 }
 0x2a4   : > { %v497_v19 = vmul.f32 %v495_v17, %v491_v18 }
 0x2a6   : > { %726 = vst.msk [vmem:[%s377_s28 + $0x18] sm:$0xff] %vm381_vm2, %v497_v19 }
 0x2a7   : > { %s1385_s7 = sld [smem:[#allocation19_spill]]  ;;  %s526_s30 = sshll.u32 %s377_s28, 4  ;;  %s527_s30 = int_to_ptr.vmem [resolvable:$true] %s526_s30 }
 0x2a8   : > { %s1386_s14 = sld [smem:[#allocation20_spill]]  ;;  %s1092_s6 = smov 256  }
 0x2a9   : > { %s1388_s11 = sld [smem:[#allocation30_spill]]  ;;  %s1093_s4 = smov 1024  }
 0x2aa   : > { %747 = sst [smem:[#allocation13]] (%p1219_p3), %s1092_s6  ;;  %s1094_s22 = smov 2  }
 0x2ab   : > { %748 = sst [smem:[#allocation13 + $0x1]] (%p1219_p3), %s1093_s4  ;;  %s1095_s13 = smov 128  }
 0x2ac   : > { %749 = sst [smem:[#allocation13 + $0x2]] (%p1219_p3), %s1094_s22  ;;  %s1096_s1 = smov 8  }
 0x2ad   : > { %s728_s9 = sshll.u32 %s1385_s7, 1  ;;  %750 = sst [smem:[#allocation13 + $0x3]] (%p1219_p3), %s1095_s13 }
 0x2ae   : > { %s729_s5 = sshll.u32 %s1386_s14, 4  ;;  %751 = sst [smem:[#allocation13 + $0x4]] (%p1219_p3), %s1095_s13 }
 0x2af   : > { %s513_s15 = sadd.s32 %s729_s5, %s728_s9  ;;  %752 = sst [smem:[#allocation13 + $0x5]] (%p1219_p3), %s1096_s1 }
 0x2b0   : > { %s730_s18 = sshll.u32 %s513_s15, 3  ;;  %s1097_s23 = smov [#allocation12]  }
 0x2b1   : > { %s515_s12 = scalar_lea.hbm %s1388_s11, %s730_s18  ;;  %s1098_s24 = smov 0  }
 0x2b2   : > { %s528_s21 = sshll.u32 %s515_s12, 4  ;;  %s529_s21 = int_to_ptr.hbm [resolvable:$true] %s528_s21 }
 0x2b3   : > { %753 = dma.general (%p1219_p3), %s527_s30, 512, %s529_s21, %s502_s27, %s1097_s23, [#allocation13], %s1098_s24, 0  }
 0x2b4 PF: > { %s1389_s8 = sld [smem:[#allocation18_spill]]  ;;  %p781_p1 = scmp.ge.s32.totalorder %s1086_s25, 2 }
 0x2b6   : > { %p773_p4 = pnand %p781_p1, %p1184_p6 }
 0x2b8   : > { %p774_p8 = pneg %p773_p4 }
 0x2ba   : > { %s556_s26 = sand.u32 1, %s1389_s8  }
 0x2bb   : > { %s557_s28 = scalar_lea.sflag [#allocation4], %s556_s26 }
 0x2bc   : > { %1053 = dma.done.wait (%p774_p8), %s557_s28, 512  }
 0x2bd   : > { %1055 = vsyncadd (%p774_p8), %s557_s28, 4294966784  ;;  %s25_s25 = sadd.s32 1, %s1086_s25   ;;  %s1391_s21 = sld [smem:[#allocation21_spill]] }
 0x2be   : > { %p22_p10 = scmp.ge.s32.totalorder %s25_s25, 10   ;;  %s1392_s22 = sld [smem:[#allocation22_spill]] }
 0x2bf   : > { %s1393_s23 = sld [smem:[#allocation24_spill]]  ;;  %s1395_s18 = smov %s1062_s19 }
 0x2c0   : > { %s1394_s24 = sld [smem:[#allocation26_spill]]  ;;  %s1396_s19 = smov %s1066_s20 }
 0x2c1   : > { %s1397_s20 = smov %s1239_s3  ;;  %24 = sbr.rel (!%p22_p10) target bundleno = 15 (0xf), region = 123 }
 0x2c6   :  { %563 = vsyncpa [#allocation3], 1 }
 0x2c7   :  { %565 = vsyncpa [#allocation3 + $0x1], 1 }
 0x2c8   :  { %566 = vsyncpa [#allocation6], 1 }
 0x2c9   :  { %568 = vsyncpa [#allocation6 + $0x1], 1 }
 0x2ca   :  { %569 = vsyncpa [#allocation9], 1 }
 0x2cb   :  { %570 = vsyncpa [#allocation4], 1 }
 0x2cc   :  { %572 = vsyncpa [#allocation4 + $0x1], 1 }

</bundles_post_ra>
